<compile_context>
chip_gen: v6e
topology: v6e:2x2x1
jax: 0.10.0
libtpu: 0.0.40
codegen_flags: <defaults>
</compile_context>

<pallas_src>
import functools
import math

import jax
import jax.numpy as jnp
from jax import lax
from jax.experimental import pallas as pl
from jax.experimental.pallas import tpu as pltpu


def _bloss_kernel(preds_ref, labels_ref, lnk_ref, *, total_cols):
    """Per-column ln(kernel density) for a lane-dense (S, TILE) slab."""
    preds = preds_ref[...].astype(jnp.float32)    # (S, T)
    labels = labels_ref[...].astype(jnp.float32)  # (1, T)
    S, T = preds.shape

    # Label-shifted single-pass variance (shift keeps |d| small since preds
    # cluster around labels).  torch.std default is unbiased (ddof = 1).
    d = preds - labels                                        # (S, T)
    s1 = jnp.sum(d, axis=0, keepdims=True)                    # (1, T)
    s2 = jnp.sum(d * d, axis=0, keepdims=True)                # (1, T)
    inv_nm1 = 1.0 / (S - 1) if S > 1 else float("nan")
    var = (s2 - s1 * s1 * (1.0 / S)) * inv_nm1                # (1, T)
    # Guard: rounding can make the shifted variance slightly negative, which
    # would turn rsqrt into NaN.  Clamp is (1,T)-cheap (review recommendation).
    var = jnp.maximum(var, 0.0)

    # neg_inv_h = -1/h = -(S^0.2/0.6) * rsqrt(var): one per-column rsqrt, with
    # the negation folded in so the (S,T) slab sees a single multiply before
    # the EUP exp (VALU trim).
    neg_inv_h = (-(float(S) ** 0.2) / 0.6) * lax.rsqrt(var)   # (1, T)
    inv_h = -neg_inv_h                                        # (1, T)

    # sech^2(z)/4 = t / (1 + t)^2  with  t = exp(-2|z|) = exp(-|d|/h),
    # z = 0.5*|d|/h.  Single EUP exp per element, no cosh, no full-size divide.
    t = jnp.exp(jnp.abs(d) * neg_inv_h)                       # (S, T)
    u = 1.0 + t
    r = pl.reciprocal(u, approx=True)
    r = r * (2.0 - u * r)        # one Newton step (kept for 1e-4 tolerance)
    w = t * (r * r)                                           # (S, T) = sech^2/4

    # kern = (inv_h / S) * sum_j w   (the 1/4 and the 4 cancel; all prefactors
    # live in the log so the (S,T) slab is never rescaled).
    ksum = jnp.sum(w, axis=0, keepdims=True)                  # (1, T)
    lnk = jnp.log(ksum * inv_h) - math.log(S)                 # (1, T)

    # Ragged last tile: lanes beyond the real column count read unspecified
    # HBM data; zero them so the padded output row sums exactly.
    col = pl.program_id(0) * T + lax.broadcasted_iota(jnp.int32, (1, T), 1)
    lnk = jnp.where(col < total_cols, lnk, 0.0)
    lnk_ref[...] = lnk.astype(lnk_ref.dtype)


def _pick_tile_and_vmem(total, S):
    """Column-tile width (multiple of 128 lanes) + VMEM budget per generation."""
    try:
        phys = int(pltpu.get_tpu_info().vmem_capacity_bytes)
    except Exception:
        phys = 64 * 1024 * 1024            # conservative fallback (v7x-sized)
    budget = min((phys * 3) // 4, 100 * 1024 * 1024)   # ~48 MiB v7x, ~96 MiB v5e/v6e

    if total <= 128:
        # Single whole-array block; cannot split below 128 lanes anyway.
        return total, budget

    # Footprint ~ 6 live (S, tile) f32 slabs: double-buffered input + ~4
    # materialized intermediates (d, t, u/r, w).
    per_lane_bytes = S * 4 * 6
    tile_vmem = max(128, (budget // per_lane_bytes) // 128 * 128)
    tiles128 = -(-total // 128)
    tile_two_steps = 128 * (-(-tiles128 // 2))   # >=2 grid steps (v7x 2-TC sharding)
    tile = max(128, min(tile_vmem, 1024, tile_two_steps))
    return tile, budget


@jax.jit
def bloss(preds, labels):
    """Pallas implementation of BLoss.forward(preds, labels) -> scalar."""
    if preds.ndim == 2:
        preds = preds[None]
        labels = labels[None]
    B, S, D = preds.shape
    total = B * D

    # Lane-dense layout: column c = (batch b, output dim d), c = b*D + d.
    if B == 1:
        p = preds.reshape(S, total)        # free: contiguous squeeze
    else:
        # TODO(synk): one extra HBM copy of preds; see header note.
        p = jnp.transpose(preds, (1, 0, 2)).reshape(S, total)
    l = labels.reshape(1, total)           # free: contiguous reshape

    tile, vmem_budget = _pick_tile_and_vmem(total, S)
    num_tiles = -(-total // tile)
    padded = num_tiles * tile              # only the tiny output row is padded

    lnk = pl.pallas_call(
        functools.partial(_bloss_kernel, total_cols=total),
        out_shape=jax.ShapeDtypeStruct((1, padded), jnp.float32),
        grid_spec=pltpu.PrefetchScalarGridSpec(
            num_scalar_prefetch=0,
            grid=(num_tiles,),
            in_specs=[
                pl.BlockSpec((S, tile), lambda c: (0, c)),
                pl.BlockSpec((1, tile), lambda c: (0, c)),
            ],
            out_specs=pl.BlockSpec((1, tile), lambda c: (0, c)),
        ),
        compiler_params=pltpu.CompilerParams(
            dimension_semantics=("parallel",),
            vmem_limit_bytes=vmem_budget,
        ),
    )(p, l)

    # Masked lanes are exactly 0, so summing the padded row is the exact sum.
    return -jnp.sum(lnk) / B


def _bloss_ref(preds, labels):
    """Pure-JAX reference mirroring the PyTorch module exactly."""
    if preds.ndim == 2:
        preds = preds[None]
        labels = labels[None]
    S = preds.shape[1]
    h = 0.6 * jnp.std(preds, axis=1, ddof=1) * (float(S) ** (-0.2))
    h = h[:, None]
    z = 0.5 * (labels[:, None] - preds) / h
    sech2 = 1.0 / (4.0 * h * jnp.cosh(z) ** 2)
    kern = jnp.sum(sech2, axis=1) / S
    return -jnp.sum(jnp.log(kern)) / labels.shape[0]


if __name__ == "__main__":
    key = jax.random.PRNGKey(0)
    k1, k2, k3, k4 = jax.random.split(key, 4)

    # Small case (module-doc shapes): single whole-array block, no ragged edge.
    N_batch, N_samples, N_out = 2, 8, 16
    preds = jax.random.normal(k1, (N_batch, N_samples, N_out), dtype=jnp.float32)
    labels = jax.random.normal(k2, (N_batch, N_out), dtype=jnp.float32)
    loss = bloss(preds, labels)
    jax.block_until_ready(loss)
    ref = _bloss_ref(preds, labels)
    assert jnp.allclose(loss, ref, rtol=1e-4, atol=1e-4), (loss, ref)

    # Medium case: >128 columns -> multi-step "parallel" grid plus a ragged
    # last tile handled by the in-kernel mask (no HBM-side padding).
    B2, S2, D2 = 3, 16, 50
    preds2 = jax.random.normal(k3, (B2, S2, D2), dtype=jnp.float32)
    labels2 = jax.random.normal(k4, (B2, D2), dtype=jnp.float32)
    loss2 = bloss(preds2, labels2)
    jax.block_until_ready(loss2)
    ref2 = _bloss_ref(preds2, labels2)
    assert jnp.allclose(loss2, ref2, rtol=1e-4, atol=1e-4), (loss2, ref2)

    print("KERNEL_OK")
</pallas_src>

<mosaic_0001>
module attributes {stable_mosaic.version = 11 : i64} {
  func.func @_bloss_kernel(%arg0: i32, %arg1: memref<8x32xf32, #tpu.memory_space<vmem>>, %arg2: memref<1x32xf32, #tpu.memory_space<vmem>>, %arg3: memref<1x32xf32, #tpu.memory_space<vmem>>) attributes {dimension_semantics = [#tpu.dimension_semantics<parallel>], iteration_bounds = array<i64: 1>, scalar_prefetch = 0 : i64, scratch_operands = 0 : i64, tpu.core_type = #tpu.core_type<tc>, window_params = [{transform_indices = @transform_0, window_bounds = array<i64: 8, 32>}, {transform_indices = @transform_1, window_bounds = array<i64: 1, 32>}, {transform_indices = @transform_2, window_bounds = array<i64: 1, 32>}]} {
    %c0 = arith.constant 0 : index
    %c0_0 = arith.constant 0 : index
    %0 = vector.load %arg1[%c0, %c0_0] : memref<8x32xf32, #tpu.memory_space<vmem>>, vector<8x32xf32>
    %c0_1 = arith.constant 0 : index
    %c0_2 = arith.constant 0 : index
    %1 = vector.load %arg2[%c0_1, %c0_2] : memref<1x32xf32, #tpu.memory_space<vmem>>, vector<1x32xf32>
    %2 = vector.broadcast %1 : vector<1x32xf32> to vector<8x32xf32>
    %3 = arith.subf %0, %2 : vector<8x32xf32>
    %cst = arith.constant dense<0.000000e+00> : vector<32xf32>
    %4 = vector.multi_reduction <add>, %3, %cst [0] : vector<8x32xf32> to vector<32xf32>
    %5 = vector.shape_cast %4 : vector<32xf32> to vector<1x32xf32>
    %6 = arith.mulf %3, %3 : vector<8x32xf32>
    %cst_3 = arith.constant dense<0.000000e+00> : vector<32xf32>
    %7 = vector.multi_reduction <add>, %6, %cst_3 [0] : vector<8x32xf32> to vector<32xf32>
    %8 = vector.shape_cast %7 : vector<32xf32> to vector<1x32xf32>
    %9 = arith.mulf %5, %5 : vector<1x32xf32>
    %cst_4 = arith.constant 1.250000e-01 : f32
    %10 = vector.broadcast %cst_4 : f32 to vector<1x32xf32>
    %11 = arith.mulf %9, %10 : vector<1x32xf32>
    %12 = arith.subf %8, %11 : vector<1x32xf32>
    %cst_5 = arith.constant 0.142857149 : f32
    %13 = vector.broadcast %cst_5 : f32 to vector<1x32xf32>
    %14 = arith.mulf %12, %13 : vector<1x32xf32>
    %cst_6 = arith.constant 0.000000e+00 : f32
    %15 = vector.broadcast %cst_6 : f32 to vector<1x32xf32>
    %16 = arith.maximumf %14, %15 : vector<1x32xf32>
    %17 = math.rsqrt %16 : vector<1x32xf32>
    %cst_7 = arith.constant -2.52619433 : f32
    %18 = vector.broadcast %cst_7 : f32 to vector<1x32xf32>
    %19 = arith.mulf %18, %17 : vector<1x32xf32>
    %cst_8 = arith.constant 0.000000e+00 : f32
    %20 = vector.broadcast %cst_8 : f32 to vector<1x32xf32>
    %21 = arith.subf %20, %19 : vector<1x32xf32>
    %22 = math.absf %3 : vector<8x32xf32>
    %23 = vector.broadcast %19 : vector<1x32xf32> to vector<8x32xf32>
    %24 = arith.mulf %22, %23 : vector<8x32xf32>
    %25 = math.exp %24 : vector<8x32xf32>
    %cst_9 = arith.constant 1.000000e+00 : f32
    %26 = vector.broadcast %cst_9 : f32 to vector<8x32xf32>
    %27 = arith.addf %26, %25 : vector<8x32xf32>
    %28 = tpu.reciprocal %27 {approx = true} : vector<8x32xf32> -> vector<8x32xf32>
    %29 = arith.mulf %27, %28 : vector<8x32xf32>
    %cst_10 = arith.constant 2.000000e+00 : f32
    %30 = vector.broadcast %cst_10 : f32 to vector<8x32xf32>
    %31 = arith.subf %30, %29 : vector<8x32xf32>
    %32 = arith.mulf %28, %31 : vector<8x32xf32>
    %33 = arith.mulf %32, %32 : vector<8x32xf32>
    %34 = arith.mulf %25, %33 : vector<8x32xf32>
    %cst_11 = arith.constant dense<0.000000e+00> : vector<32xf32>
    %35 = vector.multi_reduction <add>, %34, %cst_11 [0] : vector<8x32xf32> to vector<32xf32>
    %36 = vector.shape_cast %35 : vector<32xf32> to vector<1x32xf32>
    %37 = arith.mulf %36, %21 : vector<1x32xf32>
    %38 = math.log %37 : vector<1x32xf32>
    %cst_12 = arith.constant 2.07944155 : f32
    %39 = vector.broadcast %cst_12 : f32 to vector<1x32xf32>
    %40 = arith.subf %38, %39 : vector<1x32xf32>
    %c32_i32 = arith.constant 32 : i32
    %41 = arith.muli %arg0, %c32_i32 : i32
    %42 = tpu.iota {dimensions = array<i32: 1>} : vector<1x32xi32>
    %43 = vector.broadcast %41 : i32 to vector<1x32xi32>
    %44 = arith.addi %43, %42 : vector<1x32xi32>
    %c32_i32_13 = arith.constant 32 : i32
    %45 = vector.broadcast %c32_i32_13 : i32 to vector<1x32xi32>
    %46 = arith.cmpi slt, %44, %45 : vector<1x32xi32>
    %cst_14 = arith.constant 0.000000e+00 : f32
    %47 = vector.broadcast %cst_14 : f32 to vector<1x32xf32>
    %48 = arith.select %46, %40, %47 : vector<1x32xi1>, vector<1x32xf32>
    %c0_15 = arith.constant 0 : index
    %c0_16 = arith.constant 0 : index
    %49 = vector.load %arg3[%c0_15, %c0_16] : memref<1x32xf32, #tpu.memory_space<vmem>>, vector<1x32xf32>
    tpu.vector_store %arg3[%c0_15, %c0_16], %48 {strides = array<i32>} : memref<1x32xf32, #tpu.memory_space<vmem>>, vector<1x32xf32>,
    return
  }
  func.func @transform_0(%arg0: i32) -> (i32, i32) {
    %c0_i32 = arith.constant 0 : i32
    %c0_i32_0 = arith.constant 0 : i32
    return %c0_i32, %arg0 : i32, i32
  }
  func.func @transform_1(%arg0: i32) -> (i32, i32) {
    %c0_i32 = arith.constant 0 : i32
    %c0_i32_0 = arith.constant 0 : i32
    return %c0_i32, %arg0 : i32, i32
  }
  func.func @transform_2(%arg0: i32) -> (i32, i32) {
    %c0_i32 = arith.constant 0 : i32
    %c0_i32_0 = arith.constant 0 : i32
    return %c0_i32, %arg0 : i32, i32
  }
}

</mosaic_0001>

<bundles_post_ra>
// kernel: bloss.1
= control target key start
LH: loop header
LB: loop body
LE: loop exit
PB: predicated region body
PF: predicated region fallthrough
CT: control target
= control target key end

     0   :  { %vm20_vm0 = vcmask 261120   ;;  %v67_v45 = vlaneseq  ;;  %vm73_vm2 = vcmask 253952   ;;  %s116_s0 = inlined_call_operand.vmem [shape: f32[8,32], index: 0, kind: input, shape index: {}]   ;;  %s117_s1 = inlined_call_operand.vmem [shape: f32[1,32], index: 1, kind: input, shape index: {}]   ;;  %s118_s2 = inlined_call_operand.vmem [shape: f32[1,32], index: 2, kind: output, shape index: {}]  }
   0x1   :  { %v11_v0 = vld [vmem:[%s116_s0] sm:$0xff] }
   0x2   :  { %v79_v1 = vld [vmem:[%s117_s1] ss:$0 sm:$0xff]  ;;  %v68_v46 = vand.u32 127, %v67_v45 }
   0x3   :  { %v19_v2 = vsub.f32 %v11_v0, %v79_v1 }
   0x4   :  { %vm71_vm1 = vcmp.lt.s32.totalorder %v68_v46, 32 }
   0x5   :  { %v21_v3 = vsel %vm20_vm0, %v19_v2, 0.0  ;;  %v28_v4 = vmul.f32 %v19_v2, %v19_v2  ;;  %v44_v23 = vand.u32 2147483647, %v19_v2 }
   0x6   :  { %v22_v5 = vrot.slane %v21_v3, 4 }
   0x7   :  { %v29_v6 = vsel %vm20_vm0, %v28_v4, 0.0 }
   0x8   :  { %v23_v7 = vadd.f32 %v22_v5, %v21_v3  ;;  %v30_v8 = vrot.slane %v29_v6, 4 }
   0xa   :  { %v24_v9 = vrot.slane %v23_v7, 2  ;;  %v31_v10 = vadd.f32 %v30_v8, %v29_v6 }
   0xc   :  { %v25_v11 = vadd.f32 %v24_v9, %v23_v7  ;;  %v32_v12 = vrot.slane %v31_v10, 2 }
   0xe   :  { %v26_v13 = vrot.slane %v25_v11, 1  ;;  %v33_v14 = vadd.f32 %v32_v12, %v31_v10 }
  0x10   :  { %v27_v15 = vadd.f32 %v26_v13, %v25_v11  ;;  %v34_v16 = vrot.slane %v33_v14, 1 }
  0x12   :  { %v35_v17 = vadd.f32 %v34_v16, %v33_v14  ;;  %v36_v18 = vmul.f32 %v27_v15, %v27_v15 }
  0x14   :  { %v37_v19 = vmul.f32 0.125, %v36_v18 }
  0x16   :  { %v38_v20 = vsub.f32 %v35_v17, %v37_v19 }
  0x18   :  { %v39_v21 = vmul.f32 0.14285715, %v38_v20 }
  0x1a   :  { %v40_v22 = vmax.f32 %v39_v21, 0.0 }
  0x1c   :  { %81 = vrsqrt.f32 %v40_v22 }
  0x29   :  { %v82_v24 = vpop.eup %81 }
  0x2a   :  { %v42_v25 = vmul.f32 -2.5261943, %v82_v24 }
  0x2c   :  { %v45_v26 = vmul.f32 %v44_v23, %v42_v25  ;;  %v43_v41 = vsub.f32 0.0, %v42_v25 }
  0x2e   :  { %v46_v27 = vmul.f32 1.442695, %v45_v26 }
  0x30   :  { %83 = vpow2.f32 %v46_v27 }
  0x3d   :  { %v84_v28 = vpop.eup %83 }
  0x3e   :  { %v48_v29 = vadd.f32 1.0, %v84_v28 }
  0x40   :  { %85 = vrcp.f32 %v48_v29 }
  0x4d   :  { %v86_v30 = vpop.eup %85 }
  0x4e   :  { %v50_v31 = vmul.f32 %v86_v30, %v48_v29 }
  0x50   :  { %v51_v32 = vsub.f32 2.0, %v50_v31 }
  0x52   :  { %v52_v33 = vmul.f32 %v86_v30, %v51_v32 }
  0x54   :  { %v53_v34 = vmul.f32 %v52_v33, %v52_v33 }
  0x56   :  { %v54_v35 = vmul.f32 %v84_v28, %v53_v34 }
  0x58   :  { %v55_v36 = vsel %vm20_vm0, %v54_v35, 0.0 }
  0x59   :  { %v56_v37 = vrot.slane %v55_v36, 4 }
  0x5b   :  { %v57_v38 = vadd.f32 %v56_v37, %v55_v36 }
  0x5d   :  { %v58_v39 = vrot.slane %v57_v38, 2 }
  0x5f   :  { %v59_v40 = vadd.f32 %v58_v39, %v57_v38 }
  0x61   :  { %v60_v42 = vrot.slane %v59_v40, 1 }
  0x63   :  { %v61_v43 = vadd.f32 %v60_v42, %v59_v40 }
  0x65   :  { %v62_v44 = vmul.f32 %v61_v43, %v43_v41 }
  0x67   :  { %87 = vlog2.f32 %v62_v44 }
  0x74   :  { %v88_v47 = vpop.eup %87 }
  0x75   :  { %v64_v48 = vmul.f32 0.6931472, %v88_v47 }
  0x77   :  { %v80_v49 = vadd.f32 -2.0794415, %v64_v48 }
  0x79   :  { %v72_v50 = vsel %vm71_vm1, %v80_v49, 0.0 }
  0x7a   :  { %74 = vst.msk [vmem:[%s118_s2] sm:$0x1] %vm73_vm2, %v72_v50 }

</bundles_post_ra>
